<compile_context>
chip_gen: v6e
topology: v6e:2x2x1
jax: 0.10.0
libtpu: 0.0.40
codegen_flags: <defaults>
</compile_context>

<pallas_src>
import jax
import jax.numpy as jnp
from jax.experimental import pallas as pl
from jax.experimental.pallas import tpu as pltpu

# Logical sizes.
D_CATE, D_TRAT, D_IRAT = 60, 70, 100
D_HID = 144
D_OUT = 32

_TM_ALIGN = 16   # bf16 sublane tile (intermediates are bf16); also covers f32's 8.


def _round_up(x, m):
    return ((x + m - 1) // m) * m


def _cdiv(a, b):
    return -(-a // b)


# --------------------------------------------------------------------------
# Kernel: three small MXU matmuls against resident fused weights,
#         f32 accumulation, one f32 bias add, compact [tm, 32] f32 store.
# --------------------------------------------------------------------------
def attr_nn_kernel(c_ref, t_ref, i_ref, wc_ref, wt_ref, wi_ref, b_ref, o_ref):
    cd = wc_ref.dtype
    acc = jnp.dot(c_ref[...].astype(cd), wc_ref[...],
                  preferred_element_type=jnp.float32)
    acc += jnp.dot(t_ref[...].astype(cd), wt_ref[...],
                   preferred_element_type=jnp.float32)
    acc += jnp.dot(i_ref[...].astype(cd), wi_ref[...],
                   preferred_element_type=jnp.float32)
    o_ref[...] = (acc + b_ref[...]).astype(o_ref.dtype)


# --------------------------------------------------------------------------
# One-time parameter packing (layer collapse; done at init, NOT per call).
# --------------------------------------------------------------------------
def pack_params(params, compute_dtype=jnp.bfloat16):
    w1, b1, w2, b2, w3, b3, w4, b4 = params
    wc = w1.T @ w4[:, 0:48].T            # [60, 32]
    wt = w2.T @ w4[:, 48:96].T           # [70, 32]
    wi = w3.T @ w4[:, 96:144].T          # [100, 32]
    b_fused = jnp.concatenate([b1, b2, b3]) @ w4.T + b4   # [32]
    return (wc.astype(compute_dtype),
            wt.astype(compute_dtype),
            wi.astype(compute_dtype),
            b_fused.reshape(1, D_OUT).astype(jnp.float32))


# --------------------------------------------------------------------------
# Forward factory: returns (batched_forward, single_vector_forward).
# --------------------------------------------------------------------------
def make_attr_nn(params, *, block_m=1024, compute_dtype=jnp.bfloat16):
    wc, wt, wi, b_fused = pack_params(params, compute_dtype)

    @jax.jit
    def forward_batched(cate, trat, irat):
        """cate [B,60], trat [B,70], irat [B,100] -> [B,32] float32."""
        B = cate.shape[0]

        # Tiny batches: pad up to one minimal tile (negligible copy) so a
        # block never exceeds the array extent.
        if B < _TM_ALIGN:
            pad = _TM_ALIGN - B
            cate = jnp.pad(cate, ((0, pad), (0, 0)))
            trat = jnp.pad(trat, ((0, pad), (0, 0)))
            irat = jnp.pad(irat, ((0, pad), (0, 0)))
        bp = cate.shape[0]

        # Batch tile: as big as block_m, but split into >= 2 grid steps when
        # the batch allows so the "parallel" axis shards across v7x's 2 TCs.
        tm = min(block_m,
                 _round_up(_cdiv(bp, 2), _TM_ALIGN),
                 (bp // _TM_ALIGN) * _TM_ALIGN)
        tm = max(tm, _TM_ALIGN)
        grid_m = _cdiv(bp, tm)   # boundary block (if any) is masked by Pallas

        out = pl.pallas_call(
            attr_nn_kernel,
            out_shape=jax.ShapeDtypeStruct((bp, D_OUT), jnp.float32),
            grid_spec=pltpu.PrefetchScalarGridSpec(
                num_scalar_prefetch=0,
                grid=(grid_m,),
                in_specs=[
                    pl.BlockSpec((tm, D_CATE), lambda i: (i, 0)),     # f32 tile
                    pl.BlockSpec((tm, D_TRAT), lambda i: (i, 0)),     # f32 tile
                    pl.BlockSpec((tm, D_IRAT), lambda i: (i, 0)),     # f32 tile
                    pl.BlockSpec((D_CATE, D_OUT), lambda i: (0, 0)),  # resident
                    pl.BlockSpec((D_TRAT, D_OUT), lambda i: (0, 0)),  # resident
                    pl.BlockSpec((D_IRAT, D_OUT), lambda i: (0, 0)),  # resident
                    pl.BlockSpec((1, D_OUT), lambda i: (0, 0)),       # resident
                ],
                out_specs=pl.BlockSpec((tm, D_OUT), lambda i: (i, 0)),
            ),
            compiler_params=pltpu.CompilerParams(
                dimension_semantics=("parallel",)),
        )(cate, trat, irat, wc, wt, wi, b_fused)

        return out[:B] if bp != B else out

    def forward_single(cate_vec, t_ratio_vec, i_ratio_vec):
        """Original module semantics: 1-D inputs, torch.cat(dim=0) -> (32,)."""
        # TODO(synk): for genuinely single-vector inference the pallas_call
        # dispatch dominates the ~15 KFLOPs; prefer the batched entry point.
        out = forward_batched(cate_vec.reshape(1, D_CATE),
                              t_ratio_vec.reshape(1, D_TRAT),
                              i_ratio_vec.reshape(1, D_IRAT))
        return out.reshape(D_OUT)

    return forward_batched, forward_single


# --------------------------------------------------------------------------
# Pure-JAX reference (same math as the PyTorch module) + init.
# --------------------------------------------------------------------------
def attr_nn_reference(cate, trat, irat, params):
    w1, b1, w2, b2, w3, b3, w4, b4 = params
    c = cate @ w1.T + b1
    t = trat @ w2.T + b2
    i = irat @ w3.T + b3
    h = jnp.concatenate([c, t, i], axis=-1)
    return h @ w4.T + b4


def init_params(key):
    """Deterministic PyTorch-style (uniform +/- 1/sqrt(fan_in)) init."""
    def linear(key, fan_in, fan_out):
        kw, kb = jax.random.split(key)
        bound = 1.0 / jnp.sqrt(jnp.float32(fan_in))
        w = jax.random.uniform(kw, (fan_out, fan_in), jnp.float32, -bound, bound)
        b = jax.random.uniform(kb, (fan_out,), jnp.float32, -bound, bound)
        return w, b

    k1, k2, k3, k4 = jax.random.split(key, 4)
    w1, b1 = linear(k1, D_CATE, 48)
    w2, b2 = linear(k2, D_TRAT, 48)
    w3, b3 = linear(k3, D_IRAT, 48)
    w4, b4 = linear(k4, D_HID, D_OUT)
    return (w1, b1, w2, b2, w3, b3, w4, b4)


if __name__ == "__main__":
    key = jax.random.PRNGKey(0)
    kp, kc, kt, ki = jax.random.split(key, 4)

    params = init_params(kp)
    forward_batched, forward_single = make_attr_nn(params)

    # Small batched example.
    B = 8
    cate = jax.random.normal(kc, (B, D_CATE), jnp.float32)
    trat = jax.random.normal(kt, (B, D_TRAT), jnp.float32)
    irat = jax.random.normal(ki, (B, D_IRAT), jnp.float32)
    ref = attr_nn_reference(cate, trat, irat, params)

    # f32 sanity check of the layer-collapse packing math (tight tolerance,
    # independent of bf16 quantization in the kernel).
    w1, b1, w2, b2, w3, b3, w4, b4 = params
    fused_ref = (cate @ (w1.T @ w4[:, 0:48].T)
                 + trat @ (w2.T @ w4[:, 48:96].T)
                 + irat @ (w3.T @ w4[:, 96:144].T)
                 + (jnp.concatenate([b1, b2, b3]) @ w4.T + b4))
    assert jnp.allclose(fused_ref, ref, atol=1e-4, rtol=1e-4), (
        float(jnp.max(jnp.abs(fused_ref - ref))))

    out = forward_batched(cate, trat, irat)
    jax.block_until_ready(out)
    assert out.shape == (B, D_OUT), out.shape
    # bf16 MXU operands with f32 accumulation -> loosened tolerance.
    assert jnp.allclose(out, ref, atol=5e-2, rtol=5e-2), (
        float(jnp.max(jnp.abs(out - ref))))

    # Larger batch: exercises a multi-step "parallel" grid and a masked
    # partial boundary tile (100 rows, tm=64 -> 2 grid steps).
    kc2, kt2, ki2 = jax.random.split(jax.random.PRNGKey(1), 3)
    B2 = 100
    cate2 = jax.random.normal(kc2, (B2, D_CATE), jnp.float32)
    trat2 = jax.random.normal(kt2, (B2, D_TRAT), jnp.float32)
    irat2 = jax.random.normal(ki2, (B2, D_IRAT), jnp.float32)
    out2 = forward_batched(cate2, trat2, irat2)
    jax.block_until_ready(out2)
    ref2 = attr_nn_reference(cate2, trat2, irat2, params)
    assert out2.shape == (B2, D_OUT), out2.shape
    assert jnp.allclose(out2, ref2, atol=5e-2, rtol=5e-2), (
        float(jnp.max(jnp.abs(out2 - ref2))))

    # Single-vector path (exactly the original forward signature).
    out1 = forward_single(cate[0], trat[0], irat[0])
    jax.block_until_ready(out1)
    assert out1.shape == (D_OUT,), out1.shape
    assert jnp.allclose(out1, ref[0], atol=5e-2, rtol=5e-2), (
        float(jnp.max(jnp.abs(out1 - ref[0]))))

    print("KERNEL_OK")
</pallas_src>

<mosaic_0001>
module attributes {stable_mosaic.version = 11 : i64} {
  func.func @attr_nn_kernel(%arg0: i32, %arg1: memref<16x60xf32, #tpu.memory_space<vmem>>, %arg2: memref<16x70xf32, #tpu.memory_space<vmem>>, %arg3: memref<16x100xf32, #tpu.memory_space<vmem>>, %arg4: memref<60x32xbf16, #tpu.memory_space<vmem>>, %arg5: memref<70x32xbf16, #tpu.memory_space<vmem>>, %arg6: memref<100x32xbf16, #tpu.memory_space<vmem>>, %arg7: memref<1x32xf32, #tpu.memory_space<vmem>>, %arg8: memref<16x32xf32, #tpu.memory_space<vmem>>) attributes {dimension_semantics = [#tpu.dimension_semantics<parallel>], iteration_bounds = array<i64: 1>, scalar_prefetch = 0 : i64, scratch_operands = 0 : i64, tpu.core_type = #tpu.core_type<tc>, window_params = [{transform_indices = @transform_0, window_bounds = array<i64: 16, 60>}, {transform_indices = @transform_1, window_bounds = array<i64: 16, 70>}, {transform_indices = @transform_2, window_bounds = array<i64: 16, 100>}, {pipeline_mode = #tpu.pipeline_mode<synchronous>, transform_indices = @transform_3, window_bounds = array<i64: 60, 32>}, {pipeline_mode = #tpu.pipeline_mode<synchronous>, transform_indices = @transform_4, window_bounds = array<i64: 70, 32>}, {pipeline_mode = #tpu.pipeline_mode<synchronous>, transform_indices = @transform_5, window_bounds = array<i64: 100, 32>}, {pipeline_mode = #tpu.pipeline_mode<synchronous>, transform_indices = @transform_6, window_bounds = array<i64: 1, 32>}, {transform_indices = @transform_7, window_bounds = array<i64: 16, 32>}]} {
    %c0 = arith.constant 0 : index
    %c0_0 = arith.constant 0 : index
    %0 = vector.load %arg1[%c0, %c0_0] : memref<16x60xf32, #tpu.memory_space<vmem>>, vector<16x60xf32>
    %1 = arith.truncf %0 : vector<16x60xf32> to vector<16x60xbf16>
    %c0_1 = arith.constant 0 : index
    %c0_2 = arith.constant 0 : index
    %2 = vector.load %arg4[%c0_1, %c0_2] : memref<60x32xbf16, #tpu.memory_space<vmem>>, vector<60x32xbf16>
    %cst = arith.constant dense<0.000000e+00> : vector<16x32xf32>
    %3 = tpu.matmul %1, %2, %cst {dimension_numbers = #tpu.dot_dimension_numbers<[1], [0], [0], [1], [0, 0, 1, 1], [], []>} : vector<16x60xbf16>, vector<60x32xbf16>, vector<16x32xf32> -> vector<16x32xf32>
    %c0_3 = arith.constant 0 : index
    %c0_4 = arith.constant 0 : index
    %4 = vector.load %arg2[%c0_3, %c0_4] : memref<16x70xf32, #tpu.memory_space<vmem>>, vector<16x70xf32>
    %5 = arith.truncf %4 : vector<16x70xf32> to vector<16x70xbf16>
    %c0_5 = arith.constant 0 : index
    %c0_6 = arith.constant 0 : index
    %6 = vector.load %arg5[%c0_5, %c0_6] : memref<70x32xbf16, #tpu.memory_space<vmem>>, vector<70x32xbf16>
    %cst_7 = arith.constant dense<0.000000e+00> : vector<16x32xf32>
    %7 = tpu.matmul %5, %6, %cst_7 {dimension_numbers = #tpu.dot_dimension_numbers<[1], [0], [0], [1], [0, 0, 1, 1], [], []>} : vector<16x70xbf16>, vector<70x32xbf16>, vector<16x32xf32> -> vector<16x32xf32>
    %8 = arith.addf %3, %7 : vector<16x32xf32>
    %c0_8 = arith.constant 0 : index
    %c0_9 = arith.constant 0 : index
    %9 = vector.load %arg3[%c0_8, %c0_9] : memref<16x100xf32, #tpu.memory_space<vmem>>, vector<16x100xf32>
    %10 = arith.truncf %9 : vector<16x100xf32> to vector<16x100xbf16>
    %c0_10 = arith.constant 0 : index
    %c0_11 = arith.constant 0 : index
    %11 = vector.load %arg6[%c0_10, %c0_11] : memref<100x32xbf16, #tpu.memory_space<vmem>>, vector<100x32xbf16>
    %cst_12 = arith.constant dense<0.000000e+00> : vector<16x32xf32>
    %12 = tpu.matmul %10, %11, %cst_12 {dimension_numbers = #tpu.dot_dimension_numbers<[1], [0], [0], [1], [0, 0, 1, 1], [], []>} : vector<16x100xbf16>, vector<100x32xbf16>, vector<16x32xf32> -> vector<16x32xf32>
    %13 = arith.addf %8, %12 : vector<16x32xf32>
    %c0_13 = arith.constant 0 : index
    %c0_14 = arith.constant 0 : index
    %14 = vector.load %arg7[%c0_13, %c0_14] : memref<1x32xf32, #tpu.memory_space<vmem>>, vector<1x32xf32>
    %15 = vector.broadcast %14 : vector<1x32xf32> to vector<16x32xf32>
    %16 = arith.addf %13, %15 : vector<16x32xf32>
    %c0_15 = arith.constant 0 : index
    %c0_16 = arith.constant 0 : index
    %17 = vector.load %arg8[%c0_15, %c0_16] : memref<16x32xf32, #tpu.memory_space<vmem>>, vector<16x32xf32>
    tpu.vector_store %arg8[%c0_15, %c0_16], %16 {strides = array<i32>} : memref<16x32xf32, #tpu.memory_space<vmem>>, vector<16x32xf32>,
    return
  }
  func.func @transform_0(%arg0: i32) -> (i32, i32) {
    %c0_i32 = arith.constant 0 : i32
    %c0_i32_0 = arith.constant 0 : i32
    return %arg0, %c0_i32 : i32, i32
  }
  func.func @transform_1(%arg0: i32) -> (i32, i32) {
    %c0_i32 = arith.constant 0 : i32
    %c0_i32_0 = arith.constant 0 : i32
    return %arg0, %c0_i32 : i32, i32
  }
  func.func @transform_2(%arg0: i32) -> (i32, i32) {
    %c0_i32 = arith.constant 0 : i32
    %c0_i32_0 = arith.constant 0 : i32
    return %arg0, %c0_i32 : i32, i32
  }
  func.func @transform_3(%arg0: i32) -> (i32, i32) {
    %c0_i32 = arith.constant 0 : i32
    %c0_i32_0 = arith.constant 0 : i32
    %c0_i32_1 = arith.constant 0 : i32
    return %c0_i32, %c0_i32_0 : i32, i32
  }
  func.func @transform_4(%arg0: i32) -> (i32, i32) {
    %c0_i32 = arith.constant 0 : i32
    %c0_i32_0 = arith.constant 0 : i32
    %c0_i32_1 = arith.constant 0 : i32
    return %c0_i32, %c0_i32_0 : i32, i32
  }
  func.func @transform_5(%arg0: i32) -> (i32, i32) {
    %c0_i32 = arith.constant 0 : i32
    %c0_i32_0 = arith.constant 0 : i32
    %c0_i32_1 = arith.constant 0 : i32
    return %c0_i32, %c0_i32_0 : i32, i32
  }
  func.func @transform_6(%arg0: i32) -> (i32, i32) {
    %c0_i32 = arith.constant 0 : i32
    %c0_i32_0 = arith.constant 0 : i32
    %c0_i32_1 = arith.constant 0 : i32
    return %c0_i32, %c0_i32_0 : i32, i32
  }
  func.func @transform_7(%arg0: i32) -> (i32, i32) {
    %c0_i32 = arith.constant 0 : i32
    %c0_i32_0 = arith.constant 0 : i32
    return %arg0, %c0_i32 : i32, i32
  }
}

</mosaic_0001>

<bundles_post_ra>
// kernel: forward_batched.1
= control target key start
LH: loop header
LB: loop body
LE: loop exit
PB: predicated region body
PF: predicated region fallthrough
CT: control target
= control target key end

     0   :  { %12 = vsyncpa [#allocation3], 0  ;;  %s461_s24 = smov [#allocation2]   ;;  %s591_s0 = inlined_call_operand.vmem [shape: f32[16,60], index: 0, kind: input, shape index: {}]   ;;  %s592_s1 = inlined_call_operand.vmem [shape: f32[16,70], index: 1, kind: input, shape index: {}]   ;;  %s593_s2 = inlined_call_operand.vmem [shape: f32[16,100], index: 2, kind: input, shape index: {}]   ;;  %s594_s3 = inlined_call_operand.vmem [shape: bf16[60,32], index: 3, kind: input, shape index: {}]   ;;  %s595_s4 = inlined_call_operand.hbm [shape: bf16[70,32], index: 4, kind: input, shape index: {}]   ;;  %s596_s5 = inlined_call_operand.vmem [shape: bf16[100,32], index: 5, kind: input, shape index: {}]   ;;  %s597_s6 = inlined_call_operand.vmem [shape: f32[1,32], index: 6, kind: input, shape index: {}]   ;;  %s598_s7 = inlined_call_operand.vmem [shape: f32[16,32], index: 7, kind: output, shape index: {}]  }
   0x1   :  { %s26_s25 = sshll.u32 %s461_s24, 4  ;;  %s27_s25 = int_to_ptr.vmem [resolvable:$true] %s26_s25 }
   0x2   :  { %s447_s26 = scalar_lea.vmem %s27_s25, 576  ;;  %p452_p1 = scmp.lt.s32.totalorder %s27_s25, %s27_s25 }
   0x3   :  { %p448_p0 = scmp.ne.s32.totalorder %s27_s25, %s447_s26  ;;  %p453_p2 = scmp.lt.s32.totalorder %s447_s26, %s447_s26 }
   0x5   :  { %p454_p3 = por %p453_p2, %p452_p1 }
   0x7   :  { %p455_p4 = pnand %p454_p3, %p448_p0 }
   0x9   :  { %458 = shalt.err (!%p455_p4)
}
   0xa   :  { %s462_s27 = smov 64   ;;  %s463_s28 = smov 4  }
   0xb   :  { %32 = dma.hbm_to_vmem [thread:$0]  %s595_s4, 576, %s27_s25, [#allocation3], %s462_s27, %s462_s27, %s463_s28  }
   0xc   :  { %459 = dma.done.wait [#allocation3], 576  }
   0xd   :  { %460 = vsyncadd [#allocation3], 4294966720  ;;  %v464_v0 = vmov 0.0   ;;  %vm465_vm0 = vmmov 0   ;;  %vm95_vm1 = vcmask 1042432   ;;  %vm271_vm2 = vcmask 1041408  }
   0xe   :  { %374 = vmatprep.subr.bf16.mxu0 %v464_v0  ;;  %400 = vmatprep.subr.bf16.mxu1 %v464_v0  ;;  %v423_v1 = vld [vmem:[#allocation2 + $0x20] ss:$0 sps:$4 sm:$0x77]   ;;  %v425_v3 = vld [vmem:[%s596_s5 + $0x30] ss:$0 sps:$4 sm:$0x33]  }
   0xf   :  { %384 = vmatprep.mubr.msk.bf16.mxu0 %vm465_vm0, %v464_v0  ;;  %414 = vmatprep.mubr.msk.bf16.mxu1 %vm465_vm0, %v464_v0  ;;  %v97_v2 = vsel %vm95_vm1, %v423_v1, 0  ;;  %v424_v4 = vld [vmem:[#allocation2 + $0x18] sm:$0xff]   ;;  %v273_v5 = vsel %vm271_vm2, %v425_v3, 0  ;;  %v427_v6 = vld [vmem:[%s596_s5 + $0x28] sm:$0xff]   ;;  %v426_v7 = vld [vmem:[#allocation2 + $0x10] sm:$0xff]   ;;  %vm167_vm3 = vcmask 1045504  }
  0x10   :  { %375 = vmatpush3.bf16.msra.mxu0 %v97_v2  ;;  %401 = vmatpush3.bf16.msra.mxu1 %v273_v5  ;;  %v429_v8 = vld [vmem:[%s596_s5 + $0x20] sm:$0xff]   ;;  %v428_v9 = vld [vmem:[#allocation2 + $0x8] sm:$0xff]   ;;  %v431_v10 = vld [vmem:[%s596_s5 + $0x18] sm:$0xff]   ;;  %vm91_vm4 = vcmask 572416   ;;  %vm267_vm5 = vcmask 818176   ;;  %vm163_vm6 = vcmask 490496  }
  0x11   :  { %376 = vmatprep.subr.bf16.mxu0 %v464_v0  ;;  %402 = vmatprep.subr.bf16.mxu1 %v464_v0  ;;  %v430_v11 = vld [vmem:[#allocation2] sm:$0xff]   ;;  %v53_v13 = vld [vmem:[%s592_s1 + $0x8] sm:$0xff]  ;;  %v432_v14 = vld [vmem:[%s594_s3 + $0x18] sm:$0x3f]   ;;  %vm327_vm7 = vcmask 261120  }
  0x12   :  { %v52_v12 = vld [vmem:[%s592_s1] sm:$0xff]  ;;  %v433_v15 = vld [vmem:[%s596_s5 + $0x10] sm:$0xff]   ;;  %v169_v17 = vsel %vm167_vm3, %v432_v14, 0  ;;  %v435_v18 = vld [vmem:[%s596_s5 + $0x8] sm:$0xff]  }
  0x13   :  { %v54_v16 = vpack.c.bf16 %v53_v13, %v52_v12  ;;  %v434_v19 = vld [vmem:[%s594_s3 + $0x10] sm:$0xff]   ;;  %v437_v20 = vld [vmem:[%s596_s5] sm:$0xff]   ;;  %v213_v22 = vld [vmem:[%s593_s2 + $0x8] sm:$0xff] }
  0x14   :  { %377 = vmatpush3.bf16.msra.mxu0 %v424_v4  ;;  %403 = vmatpush3.bf16.msra.mxu1 %v427_v6  ;;  %v212_v21 = vld [vmem:[%s593_s2] sm:$0xff]  ;;  %v436_v23 = vld [vmem:[%s594_s3 + $0x8] sm:$0xff]  }
  0x15   :  { %378 = vmatprep.subr.bf16.mxu0 %v464_v0  ;;  %404 = vmatprep.subr.bf16.mxu1 %v464_v0  ;;  %v214_v24 = vpack.c.bf16 %v213_v22, %v212_v21  ;;  %v438_v25 = vld [vmem:[%s594_s3] sm:$0xff]   ;;  %v42_v27 = vld [vmem:[%s591_s0 + $0x8] sm:$0xff] }
  0x16   :  { %v41_v26 = vld [vmem:[%s591_s0] sm:$0xff] }
  0x17   :  { %v43_v28 = vpack.c.bf16 %v42_v27, %v41_v26  ;;  %v354_v39 = vld [vmem:[%s597_s6] ss:$0 sm:$0xff] }
  0x18   :  { %379 = vmatpush3.bf16.msra.mxu0 %v426_v7  ;;  %405 = vmatpush3.bf16.msra.mxu1 %v429_v8 }
  0x19   :  { %380 = vmatprep.subr.bf16.mxu0 %v464_v0  ;;  %406 = vmatprep.subr.bf16.mxu1 %v464_v0 }
  0x1c   :  { %381 = vmatpush3.bf16.msra.mxu0 %v428_v9  ;;  %407 = vmatpush3.bf16.msra.mxu1 %v431_v10 }
  0x1d   :  { %382 = vmatprep.subr.bf16.mxu0 %v464_v0  ;;  %408 = vmatprep.subr.bf16.mxu1 %v464_v0 }
  0x20   :  { %383 = vmatpush3.bf16.msra.mxu0 %v430_v11  ;;  %409 = vmatpush3.bf16.msra.mxu1 %v433_v15 }
  0x21   :  { %388 = vmatprep.subr.bf16.mxu0 %v464_v0  ;;  %410 = vmatprep.subr.bf16.mxu1 %v464_v0 }
  0x23   :  { %385 = vmatmul.mubr.msk.bf16.vlgmr.msra.gmra.mxu0 %vm91_vm4, %v54_v16 }
  0x24   :  { %389 = vmatpush3.bf16.msra.mxu0 %v169_v17  ;;  %396 = vmatprep.mubr.msk.bf16.mxu0 %vm465_vm0, %v464_v0 }
  0x25   :  { %390 = vmatprep.subr.bf16.mxu0 %v464_v0  ;;  %411 = vmatpush3.bf16.msra.mxu1 %v435_v18 }
  0x26   :  { %412 = vmatprep.subr.bf16.mxu1 %v464_v0 }
  0x28   :  { %391 = vmatpush3.bf16.msra.mxu0 %v434_v19 }
  0x29   :  { %392 = vmatprep.subr.bf16.mxu0 %v464_v0  ;;  %413 = vmatpush3.bf16.msra.mxu1 %v437_v20 }
  0x2c   :  { %393 = vmatpush3.bf16.msra.mxu0 %v436_v23  ;;  %415 = vmatmul.mubr.msk.bf16.vlgmr.msra.gmra.mxu1 %vm267_vm5, %v214_v24 }
  0x2d   :  { %394 = vmatprep.subr.bf16.mxu0 %v464_v0 }
  0x30   :  { %395 = vmatpush3.bf16.msra.mxu0 %v438_v25 }
  0x33   :  { %397 = vmatmul.mubr.msk.bf16.vlgmr.msra.gmra.mxu0 %vm163_vm6, %v43_v28 }
  0xe3   :  { %v133_v29 = vpop.f32.mrf.mxu0 }
  0xe5   :  { %v386_v30 = vpop.f32.mrf.mxu0 }
  0xe7   :  { %v136_v31 = vpop.f32.mrf.mxu0 }
  0xe9   :  { %v387_v32 = vpop.f32.mrf.mxu0 }
  0xec   :  { %v309_v33 = vpop.f32.mrf.mxu1 }
  0xee   :  { %v416_v34 = vpop.f32.mrf.mxu1 }
  0xf0   :  { %v312_v35 = vpop.f32.mrf.mxu1 }
  0xf2   :  { %v417_v37 = vpop.f32.mrf.mxu1 }
  0xf3   :  { %v205_v36 = vpop.f32.mrf.mxu0 }
  0xf4   :  { %v206_v38 = vadd.f32 %v205_v36, %v133_v29 }
  0xf5   :  { %v398_v40 = vpop.f32.mrf.mxu0 }
  0xf6   :  { %v316_v41 = vadd.f32 %v309_v33, %v206_v38 }
  0xf7   :  { %v208_v42 = vpop.f32.mrf.mxu0 }
  0xf8   :  { %v325_v43 = vadd.f32 %v354_v39, %v316_v41  ;;  %v209_v44 = vadd.f32 %v208_v42, %v136_v31 }
  0xf9   :  { %v399_v45 = vpop.f32.mrf.mxu0 }
  0xfa   :  { %328 = vst.msk [vmem:[%s598_s7] sm:$0xff] %vm327_vm7, %v325_v43  ;;  %v317_v46 = vadd.f32 %v312_v35, %v209_v44 }
  0xfc   :  { %v326_v47 = vadd.f32 %v354_v39, %v317_v46 }
  0xfe   :  { %329 = vst.msk [vmem:[%s598_s7 + $0x8] sm:$0xff] %vm327_vm7, %v326_v47 }
  0xff   :  { %334 = vsyncpa [#allocation3], 1 }

</bundles_post_ra>
